<compile_context>
chip_gen: v7x
topology: tpu7x:2x2x1
jax: 0.10.0
libtpu: 0.0.40
codegen_flags: <defaults>
</compile_context>

<pallas_src>
import functools

import numpy as np
import jax
import jax.numpy as jnp
from jax import lax
from jax.experimental import pallas as pl
from jax.experimental.pallas import tpu as pltpu

_E_M1 = float(np.exp(-1.0))
_SCALE = float(1.0 / (1.0 - np.exp(-1.0)))
_VAR_EPS = 1e-12  # guards rsqrt against all-constant columns (e.g. pure padding)


# ----------------------------- Pallas kernel -------------------------------- #
def _gmu_kernel(y_ref, s_ref, sel_ref, out_ref, *, normalize):
    # y_ref   : (F, Lt)        f32  unfolded + noised columns (one lane tile)
    # s_ref   : (2*C*P, F)     bf16 stacked [M ; G@M - 2*X^T] over channels
    # sel_ref : (C, C*P)       f32  per-channel P-sum selector (0/1)
    # out_ref : (C, Lt)        f32
    y = y_ref[...]
    f_dim = y.shape[0]

    if normalize:
        # torch.std(dim=1) is unbiased (ddof=1); single pass sum / sum-of-squares.
        col_sum = jnp.sum(y, axis=0, keepdims=True)                    # (1, Lt)
        col_ssq = jnp.sum(y * y, axis=0, keepdims=True)                # (1, Lt)
        var = (col_ssq - col_sum * col_sum * (1.0 / f_dim)) * (1.0 / (f_dim - 1))
        inv_std = lax.rsqrt(var + _VAR_EPS)                            # EUP slot
        yn = y * inv_std                                               # (F, Lt)
        s2 = col_ssq * (inv_std * inv_std)                             # sum_f yn^2
    else:
        yn = y
        s2 = jnp.sum(y * y, axis=0, keepdims=True)

    # One stacked MXU matmul (bf16 operands, f32 accumulation):
    #   rows [0, CP)   -> W  = M @ yn
    #   rows [CP, 2CP) -> DY = (G @ M - 2 X^T) @ yn = G W - 2 X^T yn
    r = jnp.dot(s_ref[...], yn.astype(jnp.bfloat16),
                preferred_element_type=jnp.float32)                    # (2CP, Lt)
    cp = r.shape[0] // 2
    t = r[:cp] * r[cp:]                                                # (CP, Lt)

    # Per-channel sum over the P regression terms as one tiny matmul
    # (avoids a (C, P, Lt) relayout / cross-sublane reduction with P = 9).
    red = jnp.dot(sel_ref[...], t, preferred_element_type=jnp.float32)  # (C, Lt)

    err = (s2 + red) * (1.0 / f_dim)                                   # (C, Lt)
    # A = (exp(-err) - e^-1)/(1 - e^-1) - 0.5, fused affine, one exp burst.
    out_ref[...] = jnp.exp(-err) * _SCALE - (_E_M1 * _SCALE + 0.5)


# ------------------------------- JAX glue ------------------------------------ #
def init_gmu_weights(key, c_out, c_in, k, num_slices, gain=0.01):
    # torch.nn.init.xavier_normal_ on a (C_out, C_in, k, k, S) tensor.
    fan_in = c_in * k * k * num_slices
    fan_out = c_out * k * k * num_slices
    std = gain * np.sqrt(2.0 / (fan_in + fan_out))
    shape = (c_out, c_in, k, k, num_slices)
    return (std * jax.random.normal(key, shape, jnp.float32)).astype(jnp.float32)


def build_regression_operators(weights, degree, decay_regress):
    # TODO(synk): `decay_regress` is an undefined global in the PyTorch source;
    # modeled here as a ridge term decay_regress * I on X^T X.
    c_out, c_in, k, _, num_slices = weights.shape
    F = c_in * k * k
    Xs = weights.reshape(c_out, F, num_slices).astype(jnp.float32)
    parts = [Xs] + [Xs ** (i + 2) for i in range(degree - 1)]          # [X, X^2, ..., X^deg]
    X = jnp.concatenate(parts, axis=2)
    X = jnp.concatenate([jnp.ones((c_out, F, 1), X.dtype), X], axis=2)  # (C, F, P)
    P = X.shape[-1]
    G = jnp.einsum('cfp,cfq->cpq', X, X)                                # X^T X
    G_inv = jnp.linalg.inv(G + decay_regress * jnp.eye(P, dtype=X.dtype))
    M = jnp.einsum('cpq,cfq->cpf', G_inv, X)                            # (C, P, F)
    return X, M, G


def pack_kernel_operands(X, M, G):
    # Stack the per-channel operators into one lane-friendly 2D matrix so the
    # kernel needs a single (2*C*P, F) matmul operand that stays VMEM-resident.
    c_out, F, P = X.shape
    D = jnp.einsum('cpq,cqf->cpf', G, M) - 2.0 * jnp.transpose(X, (0, 2, 1))
    S = jnp.concatenate([M.reshape(c_out * P, F), D.reshape(c_out * P, F)], axis=0)
    sel = jnp.repeat(jnp.eye(c_out, dtype=jnp.float32), P, axis=1)      # (C, C*P)
    return S.astype(jnp.bfloat16), sel


def im2col_nchw(x, k, padding):
    # Matches torch.nn.Unfold ordering: feature index = c*k*k + i*k + j, L row-major.
    B, C, H, W = x.shape
    xp = jnp.pad(x, ((0, 0), (0, 0), (padding, padding), (padding, padding)))
    Ho = H + 2 * padding - k + 1
    Wo = W + 2 * padding - k + 1
    cols = []
    for i in range(k):
        for j in range(k):
            cols.append(xp[:, :, i:i + Ho, j:j + Wo])                   # (B, C, Ho, Wo)
    cols = jnp.stack(cols, axis=2)                                      # (B, C, k*k, Ho, Wo)
    return cols.reshape(B, C * k * k, Ho * Wo), Ho, Wo


def _round_up(x, m):
    return (x + m - 1) // m * m


def gmu_forward(y2, weights, *, padding=0, epsilon=1e-4, degree=4,
                normalize=True, decay_regress=1e-3, noise_key=None,
                lane_tile=512):
    c_out, c_in, k, _, num_slices = weights.shape
    y, Ho, Wo = im2col_nchw(y2.astype(jnp.float32), k, padding)         # (B, F, L)
    if epsilon != 0.0 and noise_key is not None:
        # torch.randn_like noise, reproduced deterministically with a JAX key.
        y = y + epsilon * jax.random.normal(noise_key, y.shape, y.dtype)

    X, M, G = build_regression_operators(weights, degree, decay_regress)
    S, sel = pack_kernel_operands(X, M, G)

    B, F, L = y.shape
    N = B * L
    # Flatten the batch into the lane axis: wide, lane-dense N fills the MXU N
    # dimension and makes every output store an unmasked full-block vst.
    y_flat = jnp.transpose(y, (1, 0, 2)).reshape(F, N)
    lane_tile = min(_round_up(lane_tile, 128), _round_up(N, 128))
    n_pad = _round_up(N, lane_tile)
    if n_pad != N:
        y_flat = jnp.pad(y_flat, ((0, 0), (0, n_pad - N)))
    n_tiles = n_pad // lane_tile

    out_flat = pl.pallas_call(
        functools.partial(_gmu_kernel, normalize=normalize),
        out_shape=jax.ShapeDtypeStruct((c_out, n_pad), jnp.float32),
        grid_spec=pltpu.PrefetchScalarGridSpec(
            num_scalar_prefetch=0,
            grid=(n_tiles,),
            in_specs=[
                pl.BlockSpec((F, lane_tile), lambda i: (0, i)),
                pl.BlockSpec(S.shape, lambda i: (0, 0)),     # VMEM-resident weights
                pl.BlockSpec(sel.shape, lambda i: (0, 0)),   # VMEM-resident selector
            ],
            out_specs=pl.BlockSpec((c_out, lane_tile), lambda i: (0, i)),
        ),
        compiler_params=pltpu.CompilerParams(
            dimension_semantics=("parallel",)),
    )(y_flat, S, sel)

    out = out_flat[:, :N].reshape(c_out, B, Ho, Wo).transpose(1, 0, 2, 3)
    return out, (y, X, M, Ho, Wo)


# --------------------------- numpy float64 reference ------------------------- #
def reference_forward(y, X, M, Ho, Wo, normalize=True):
    # Direct residual formula, exactly as in the PyTorch module.
    y = np.asarray(y, np.float64)
    X = np.asarray(X, np.float64)
    M = np.asarray(M, np.float64)
    if normalize:
        GG = y.std(axis=1, ddof=1)                                      # (B, L)
        y = y / GG[:, None, :]
    W = np.einsum('ijk,akb->aijb', M, y)                                # (B, C, P, L)
    pred = np.einsum('bec,abcd->abed', X, W)                            # (B, C, F, L)
    err = np.mean((y[:, None] - pred) ** 2, axis=2)                     # (B, C, L)
    A = (np.exp(-err) - np.exp(-1.0)) / (1.0 - np.exp(-1.0))
    out = A - 0.5
    return out.reshape(out.shape[0], out.shape[1], Ho, Wo)


# ----------------------------------- main ------------------------------------ #
if __name__ == "__main__":
    # Small, module-consistent shapes.
    B, C_in, H, W = 2, 4, 16, 16
    C_out, k, padding = 8, 3, 1
    num_slices, degree, epsilon = 2, 4, 1e-4

    key = jax.random.PRNGKey(0)
    wkey, xkey, nkey = jax.random.split(key, 3)

    weights = init_gmu_weights(wkey, C_out, C_in, k, num_slices)        # (8, 4, 3, 3, 2)
    y2 = jax.random.normal(xkey, (B, C_in, H, W), jnp.float32)          # NCHW input

    # lane_tile=256 -> B*L = 512 lanes split into 2 parallel grid steps (keeps
    # both TensorCores busy on v7x at this toy size; raise for real workloads).
    out, (y_cols, X, M, Ho, Wo) = gmu_forward(
        y2, weights, padding=padding, epsilon=epsilon, degree=degree,
        normalize=True, decay_regress=1e-3, noise_key=nkey,
        lane_tile=256)
    out = jax.block_until_ready(out)

    ref = reference_forward(y_cols, X, M, Ho, Wo, normalize=True)
    np.testing.assert_allclose(np.asarray(out), ref, rtol=5e-3, atol=5e-3)

    print("KERNEL_OK")
</pallas_src>

<mosaic_0001>
module attributes {stable_mosaic.version = 11 : i64} {
  func.func @_gmu_kernel(%arg0: i32, %arg1: memref<36x256xf32, #tpu.memory_space<vmem>>, %arg2: memref<144x36xbf16, #tpu.memory_space<vmem>>, %arg3: memref<8x72xf32, #tpu.memory_space<vmem>>, %arg4: memref<8x256xf32, #tpu.memory_space<vmem>>) attributes {dimension_semantics = [#tpu.dimension_semantics<parallel>], iteration_bounds = array<i64: 2>, scalar_prefetch = 0 : i64, scratch_operands = 0 : i64, tpu.core_type = #tpu.core_type<tc>, window_params = [{transform_indices = @transform_0, window_bounds = array<i64: 36, 256>}, {pipeline_mode = #tpu.pipeline_mode<synchronous>, transform_indices = @transform_1, window_bounds = array<i64: 144, 36>}, {pipeline_mode = #tpu.pipeline_mode<synchronous>, transform_indices = @transform_2, window_bounds = array<i64: 8, 72>}, {transform_indices = @transform_3, window_bounds = array<i64: 8, 256>}]} {
    %c0 = arith.constant 0 : index
    %c0_0 = arith.constant 0 : index
    %0 = vector.load %arg1[%c0, %c0_0] : memref<36x256xf32, #tpu.memory_space<vmem>>, vector<36x256xf32>
    %cst = arith.constant dense<0.000000e+00> : vector<256xf32>
    %1 = vector.multi_reduction <add>, %0, %cst [0] : vector<36x256xf32> to vector<256xf32>
    %2 = vector.shape_cast %1 : vector<256xf32> to vector<1x256xf32>
    %3 = arith.mulf %0, %0 : vector<36x256xf32>
    %cst_1 = arith.constant dense<0.000000e+00> : vector<256xf32>
    %4 = vector.multi_reduction <add>, %3, %cst_1 [0] : vector<36x256xf32> to vector<256xf32>
    %5 = vector.shape_cast %4 : vector<256xf32> to vector<1x256xf32>
    %6 = arith.mulf %2, %2 : vector<1x256xf32>
    %cst_2 = arith.constant 0.027777778 : f32
    %7 = vector.broadcast %cst_2 : f32 to vector<1x256xf32>
    %8 = arith.mulf %6, %7 : vector<1x256xf32>
    %9 = arith.subf %5, %8 : vector<1x256xf32>
    %cst_3 = arith.constant 0.0285714287 : f32
    %10 = vector.broadcast %cst_3 : f32 to vector<1x256xf32>
    %11 = arith.mulf %9, %10 : vector<1x256xf32>
    %cst_4 = arith.constant 9.99999996E-13 : f32
    %12 = vector.broadcast %cst_4 : f32 to vector<1x256xf32>
    %13 = arith.addf %11, %12 : vector<1x256xf32>
    %14 = math.rsqrt %13 : vector<1x256xf32>
    %15 = vector.broadcast %14 : vector<1x256xf32> to vector<36x256xf32>
    %16 = arith.mulf %0, %15 : vector<36x256xf32>
    %17 = arith.mulf %14, %14 : vector<1x256xf32>
    %18 = arith.mulf %5, %17 : vector<1x256xf32>
    %c0_5 = arith.constant 0 : index
    %c0_6 = arith.constant 0 : index
    %19 = vector.load %arg2[%c0_5, %c0_6] : memref<144x36xbf16, #tpu.memory_space<vmem>>, vector<144x36xbf16>
    %20 = arith.truncf %16 : vector<36x256xf32> to vector<36x256xbf16>
    %cst_7 = arith.constant dense<0.000000e+00> : vector<144x256xf32>
    %21 = tpu.matmul %19, %20, %cst_7 {dimension_numbers = #tpu.dot_dimension_numbers<[1], [0], [0], [1], [0, 0, 1, 1], [], []>} : vector<144x36xbf16>, vector<36x256xbf16>, vector<144x256xf32> -> vector<144x256xf32>
    %22 = vector.extract_strided_slice %21 {offsets = [0, 0], sizes = [72, 256], strides = [1, 1]} : vector<144x256xf32> to vector<72x256xf32>
    %23 = vector.extract_strided_slice %21 {offsets = [72, 0], sizes = [72, 256], strides = [1, 1]} : vector<144x256xf32> to vector<72x256xf32>
    %24 = arith.mulf %22, %23 : vector<72x256xf32>
    %c0_8 = arith.constant 0 : index
    %c0_9 = arith.constant 0 : index
    %25 = vector.load %arg3[%c0_8, %c0_9] : memref<8x72xf32, #tpu.memory_space<vmem>>, vector<8x72xf32>
    %cst_10 = arith.constant dense<0.000000e+00> : vector<8x256xf32>
    %26 = tpu.matmul %25, %24, %cst_10 {dimension_numbers = #tpu.dot_dimension_numbers<[1], [0], [0], [1], [0, 0, 1, 1], [], []>} : vector<8x72xf32>, vector<72x256xf32>, vector<8x256xf32> -> vector<8x256xf32>
    %27 = vector.broadcast %18 : vector<1x256xf32> to vector<8x256xf32>
    %28 = arith.addf %27, %26 : vector<8x256xf32>
    %cst_11 = arith.constant 0.027777778 : f32
    %29 = vector.broadcast %cst_11 : f32 to vector<8x256xf32>
    %30 = arith.mulf %28, %29 : vector<8x256xf32>
    %cst_12 = arith.constant 0.000000e+00 : f32
    %31 = vector.broadcast %cst_12 : f32 to vector<8x256xf32>
    %32 = arith.subf %31, %30 : vector<8x256xf32>
    %33 = math.exp %32 : vector<8x256xf32>
    %cst_13 = arith.constant 1.58197665 : f32
    %34 = vector.broadcast %cst_13 : f32 to vector<8x256xf32>
    %35 = arith.mulf %33, %34 : vector<8x256xf32>
    %cst_14 = arith.constant 1.08197665 : f32
    %36 = vector.broadcast %cst_14 : f32 to vector<8x256xf32>
    %37 = arith.subf %35, %36 : vector<8x256xf32>
    %c0_15 = arith.constant 0 : index
    %c0_16 = arith.constant 0 : index
    %38 = vector.load %arg4[%c0_15, %c0_16] : memref<8x256xf32, #tpu.memory_space<vmem>>, vector<8x256xf32>
    tpu.vector_store %arg4[%c0_15, %c0_16], %37 {strides = array<i32>} : memref<8x256xf32, #tpu.memory_space<vmem>>, vector<8x256xf32>,
    return
  }
  func.func @transform_0(%arg0: i32) -> (i32, i32) {
    %c0_i32 = arith.constant 0 : i32
    %c0_i32_0 = arith.constant 0 : i32
    return %c0_i32, %arg0 : i32, i32
  }
  func.func @transform_1(%arg0: i32) -> (i32, i32) {
    %c0_i32 = arith.constant 0 : i32
    %c0_i32_0 = arith.constant 0 : i32
    %c0_i32_1 = arith.constant 0 : i32
    return %c0_i32, %c0_i32_0 : i32, i32
  }
  func.func @transform_2(%arg0: i32) -> (i32, i32) {
    %c0_i32 = arith.constant 0 : i32
    %c0_i32_0 = arith.constant 0 : i32
    %c0_i32_1 = arith.constant 0 : i32
    return %c0_i32, %c0_i32_0 : i32, i32
  }
  func.func @transform_3(%arg0: i32) -> (i32, i32) {
    %c0_i32 = arith.constant 0 : i32
    %c0_i32_0 = arith.constant 0 : i32
    return %c0_i32, %arg0 : i32, i32
  }
}

</mosaic_0001>

<bundles_post_ra>
// kernel: tpu_custom_call.1
= control target key start
LH: loop header
LB: loop body
LE: loop exit
PB: predicated region body
PF: predicated region fallthrough
CT: control target
= control target key end

     0   :  { %8 = vsyncpa [#allocation3], 0  ;;  %s1253_s0 = inlined_call_operand.hbm [shape: f32[36,512], index: 0, kind: input, shape index: {}]   ;;  %s1254_s1 = inlined_call_operand.vmem [shape: bf16[144,36], index: 1, kind: input, shape index: {}]   ;;  %s1255_s2 = inlined_call_operand.vmem [shape: f32[8,72], index: 2, kind: input, shape index: {}]   ;;  %s1256_s3 = inlined_call_operand.hbm [shape: f32[8,512], index: 3, kind: output, shape index: {}]  }
   0x1   :  { %10 = vsyncpa [#allocation3 + $0x1], 0 }
   0x2   :  { %11 = vsyncpa [#allocation4], 0 }
   0x3   :  { %13 = vsyncpa [#allocation4 + $0x1], 0  ;;  %s958_s12 = smov 0   ;;  %s960_s13 = smov 0  }
   0x4   :  { %s962_s14 = smov 0   ;;  %s964_s15 = smov 0  }
   0x5 LB: > { %s979_s16 = sadd.s32 4294967295, %s929_s15   ;;  %s705_s17 = sadd.s32 4294967294, %s929_s15   ;;  %s929_s15 = sphi %s964_s15, %s1269_s15   ;;  %s925_s14 = sphi %s962_s14, %s1268_s14   ;;  %s921_s13 = sphi %s960_s13, %s1267_s13   ;;  %s917_s12 = sphi %s958_s12, %s1266_s12  }
   0x6   : > { %s983_s18 = sadd.s32 1, %s929_s15   ;;  %s26_s19 = sadd.s32 1, %s925_s14 }
   0x7   : > { %s23_s20 = ssub.s32 %s929_s15, %s983_s18  ;;  %p33_p0 = scmp.ne.s32.totalorder %s925_s14, %s921_s13 }
   0x8   : > { %p24_p1 = scmp.eq.s32.totalorder %s23_s20, 0  ;;  %p34_p2 = scmp.eq.s32.totalorder %s929_s15, 0 }
   0x9   : > { %p39_p3 = scmp.ne.s32.totalorder %s921_s13, %s917_s12  ;;  %p40_p4 = scmp.eq.s32.totalorder %s979_s16, 0 }
   0xa   : > { %s995_s21 = scalar_select %p24_p1, %s925_s14, %s26_s19  }
   0xb   : > { %p35_p5 = por %p34_p2, %p33_p0  ;;  %p997_p6 = por %p40_p4, %p39_p3 }
   0xc   : > { %p105_p7 = scmp.eq.s32.totalorder %s979_s16, 1  ;;  %p111_p8 = scmp.eq.s32.totalorder %s705_s17, 1 }
   0xd   : > { %p777_p10 = scmp.lt.s32.totalorder %s929_s15, 2  ;;  %s137_s25 = sand.u32 1, %s925_s14  }
   0xe   : > { %p1004_p11 = por %p105_p7, %p33_p0  ;;  %p1008_p12 = por %p111_p8, %p39_p3 }
   0xf   : > { %s739_s26 = sshll.u32 %s929_s15, 8  ;;  %s763_s27 = smul.u32 80, %s137_s25 }
  0x10   : > { %s1259_s23 = scalar_select %p1004_p11, 1, 0 }
  0x11   : > { %s1260_s24 = scalar_select %p1008_p12, 1, 0 }
  0x12   : > { %s1017_s30 = scalar_lea.hbm %s1253_s0, %s739_s26  ;;  %p1019_p13 = pnand %p777_p10, %p35_p5 }
  0x13   : > { %s141_s5 = scalar_lea.vmem [#allocation2], %s763_s27  ;;  %s1026_s7 = scalar_lea.sflag [#allocation3], %s137_s25 }
  0x14   : > { %s148_s6 = sshll.u32 %s141_s5, 4  ;;  %s833_s8 = scalar_lea.hbm %s1017_s30, 1280  ;;  %s1023_s6 = int_to_ptr.vmem [resolvable:$true] %s148_s6 }
  0x15   : > { %p834_p1 = scmp.ne.s32.totalorder %s1017_s30, %s833_s8  ;;  %p835_p2 = pneg %p1019_p13 }
  0x16   : > { %s838_s11 = scalar_lea.hbm %s1253_s0, 2560  ;;  %p839_p5 = scmp.lt.u32.totalorder %s1017_s30, %s1253_s0 }
  0x17   : > { %p836_p3 = pnand %p835_p2, %p834_p1  ;;  %p840_p7 = scmp.lt.u32.totalorder %s838_s11, %s833_s8 }
  0x18   : > { %p842_p10 = scmp.lt.u32.totalorder %s833_s8, %s1017_s30 }
  0x19   : > { %p837_p4 = pneg %p836_p3  ;;  %p841_p8 = por %p840_p7, %p839_p5 }
  0x1b   : > { %p843_p9 = por %p842_p10, %p841_p8 }
  0x1d   : > { %p844_p0 = pnand %p843_p9, %p837_p4 }
  0x1f   : > { %847 = shalt.err (!%p844_p0)
}
  0x20   : > { %s848_s20 = scalar_lea.vmem %s1023_s6, 1280  ;;  %s931_s25 = smov [#allocation2]  }
  0x21   : > { %p849_p1 = scmp.ne.s32.totalorder %s1023_s6, %s848_s20  ;;  %s853_s26 = sshll.u32 %s931_s25, 4  ;;  %s854_s26 = int_to_ptr.vmem [resolvable:$false] %s853_s26 }
  0x22   : > { %s855_s27 = scalar_lea.vmem %s854_s26, 2560  ;;  %p856_p11 = scmp.lt.s32.totalorder %s1023_s6, %s854_s26 }
  0x23   : > { %p851_p3 = pnand %p849_p1, %p835_p2  ;;  %p857_p5 = scmp.lt.s32.totalorder %s855_s27, %s848_s20 }
  0x25   : > { %p852_p12 = pneg %p851_p3  ;;  %p858_p7 = por %p857_p5, %p856_p11 }
  0x27   : > { %p859_p8 = pnand %p858_p7, %p852_p12 }
  0x29   : > { %862 = shalt.err (!%p859_p8)
}
  0x2a   : > { %s932_s28 = smov 512   ;;  %s933_s29 = smov 256  }
  0x2b   : > { %s934_s5 = smov 16   ;;  %p156_p9 = scmp.lt.s32.totalorder %s929_s15, 3 }
  0x2c   : > { %772 = dma.hbm_to_vmem [thread:$0]  (!%p1019_p13), %s1017_s30, 1280, %s1023_s6, %s1026_s7, %s932_s28, %s933_s29, %s934_s5  }
  0x2d   : > { %p1262_p0 = scmp.ge.s32.totalorder %s929_s15, 1 }
  0x2f   : > { %p157_p2 = pnand %p1262_p0, %p156_p9 }
  0x30   : > { %s1058_s8 = sand.u32 (!%p157_p2), 1, %s921_s13  }
  0x31   : > { %160 = sbr.rel (%p157_p2) target bundleno = 635 (0x27b), region = 32  ;;  %s163_s10 = scalar_lea.sflag (!%p157_p2), [#allocation3], %s1058_s8 }
  0x32   : > { %s764_s9 = smul.u32 (!%p157_p2), 80, %s1058_s8 }
  0x34   : > { %s166_s11 = scalar_lea.vmem (!%p157_p2), [#allocation2], %s764_s9 }
  0x38   : > { %908 = dma.done.wait (%p997_p6), %s163_s10, 1280  }
  0x39   : > { %910 = vsyncadd (%p997_p6), %s163_s10, 4294966016  ;;  %v935_v0 = vmov 0   ;;  %v1068_v1 = vld [vmem:[%s166_s11 + $0x8] sm:$0xff]  ;;  %v1070_v2 = vld [vmem:[%s166_s11 + $0x18] sm:$0xff]  ;;  %vm205_vm0 = vcmask 1043456   ;;  %vm380_vm1 = vcmask 1041408  }
  0x3a   : > { %419 = vmatprep.mubr.bf16.mxu0 %v935_v0  ;;  %469 = vmatprep.mubr.bf16.mxu1 %v935_v0  ;;  %v1072_v3 = vld [vmem:[%s166_s11 + $0x28] sm:$0xff]  ;;  %v1074_v4 = vld [vmem:[%s166_s11 + $0x38] sm:$0xff]  ;;  %v214_v6 = vadd.f32 %v1070_v2, %v1068_v1  ;;  %v226_v7 = vmul.f32 %v1068_v1, %v1068_v1  ;;  %v228_v8 = vmul.f32 %v1070_v2, %v1070_v2  ;;  %v1086_v10 = vld [vmem:[%s166_s11] sm:$0xff]  ;;  %vm352_vm2 = vcmask 293888   ;;  %s711_s6 = sshll.u32 %s1058_s8, 4  ;;  %s740_s7 = sshll.u32 %s979_s16, 8 }
  0x3b   : > { %v1076_v5 = vld [vmem:[%s166_s11 + $0x48] sm:$0xf]  ;;  %v230_v9 = vmul.f32 %v1072_v3, %v1072_v3  ;;  %v232_v11 = vmul.f32 %v1074_v4, %v1074_v4  ;;  %v1092_v13 = vld [vmem:[%s166_s11 + $0x10] sm:$0xff]  ;;  %v1094_v14 = vld [vmem:[%s166_s11 + $0x20] sm:$0xff]  ;;  %v225_v15 = vmul.f32 %v1086_v10, %v1086_v10  ;;  %vm529_vm3 = vcmask 588800   ;;  %s188_s17 = scalar_lea.vmem [#allocation5], %s711_s6  ;;  %s1209_s26 = scalar_lea.hbm %s1256_s3, %s740_s7 }
  0x3c   : > { %v234_v12 = vmul.f32 %v1076_v5, %v1076_v5  ;;  %v215_v16 = vadd.f32 %v214_v6, %v1072_v3  ;;  %v246_v17 = vadd.f32 %v228_v8, %v226_v7  ;;  %v1099_v18 = vld [vmem:[%s166_s11 + $0x40] sm:$0xf]  ;;  %v202_v19 = vadd.f32 %v1092_v13, %v1086_v10  ;;  %v1107_v22 = vld [vmem:[%s166_s11 + $0x30] sm:$0xff]  ;;  %s635_s19 = sshll.u32 %s188_s17, 4  ;;  %s621_s27 = scalar_lea.sflag [#allocation4], %s1058_s8  ;;  %s1211_s19 = int_to_ptr.vmem [resolvable:$true] %s635_s19 }
  0x3d   : > { %v227_v20 = vmul.f32 %v1092_v13, %v1092_v13  ;;  %v217_v21 = vsel %vm205_vm0, %v1076_v5, 0.0  ;;  %v229_v23 = vmul.f32 %v1094_v14, %v1094_v14  ;;  %v233_v27 = vmul.f32 %v1099_v18, %v1099_v18  ;;  %s863_s28 = scalar_lea.vmem %s1211_s19, 256  ;;  %p1263_p11 = scmp.ne.s32.totalorder %s1259_s23, 0 }
  0x3e   : > { %v216_v24 = vadd.f32 %v215_v16, %v1074_v4  ;;  %v247_v25 = vadd.f32 %v246_v17, %v230_v9  ;;  %v203_v26 = vadd.f32 %v202_v19, %v1094_v14  ;;  %v249_v28 = vsel %vm205_vm0, %v234_v12, 0.0  ;;  %p864_p6 = scmp.ne.s32.totalorder %s1211_s19, %s863_s28  ;;  %s937_s16 = smov [#allocation5]  }
  0x3f   : > { %v206_v29 = vsel %vm205_vm0, %v1099_v18, 0.0  ;;  %v231_v30 = vmul.f32 %v1107_v22, %v1107_v22  ;;  %v235_v31 = vadd.f32 %v227_v20, %v225_v15  ;;  %v238_v39 = vsel %vm205_vm0, %v233_v27, 0.0  ;;  %s867_s29 = sshll.u32 %s937_s16, 4  ;;  %s868_s29 = int_to_ptr.vmem [resolvable:$false] %s867_s29 }
  0x40   : > { %v218_v32 = vadd.f32 %v217_v21, %v216_v24  ;;  %v248_v33 = vadd.f32 %v247_v25, %v232_v11  ;;  %v204_v34 = vadd.f32 %v203_v26, %v1107_v22  ;;  %p865_p12 = pnand %p864_p6, %p1263_p11  ;;  %s869_s5 = scalar_lea.vmem %s868_s29, 512 }
  0x41   : > { %v236_v35 = vadd.f32 %v235_v31, %v229_v23  ;;  %p870_p4 = scmp.lt.s32.totalorder %s1211_s19, %s868_s29  ;;  %p871_p10 = scmp.lt.s32.totalorder %s869_s5, %s863_s28 }
  0x42   : > { %v219_v36 = vrot.slane %v218_v32, 4  ;;  %v250_v37 = vadd.f32 %v249_v28, %v248_v33  ;;  %v207_v38 = vadd.f32 %v206_v29, %v204_v34  ;;  %v818_v33 = vld [vmem:[%s1254_s1 + $0x8] sm:$0xff]   ;;  %v819_v34 = vld [vmem:[%s1254_s1 + $0x30] sm:$0xff]   ;;  %p866_p13 = pneg %p865_p12 }
  0x43   : > { %v237_v40 = vadd.f32 %v236_v35, %v231_v30  ;;  %v820_v35 = vld [vmem:[%s1254_s1 + $0x10] sm:$0xff]   ;;  %p872_p1 = por %p871_p10, %p870_p4 }
  0x44   : > { %v220_v41 = vadd.f32 %v219_v36, %v218_v32  ;;  %v251_v42 = vrot.slane %v250_v37, 4  ;;  %v208_v43 = vrot.slane %v207_v38, 4  ;;  %v821_v36 = vld [vmem:[%s1254_s1 + $0x38] sm:$0xff]  }
  0x45   : > { %v239_v44 = vadd.f32 %v238_v39, %v237_v40  ;;  %v824_v39 = vld [vmem:[%s1254_s1 + $0x20] sm:$0xff]   ;;  %v936_v40 = vmov 0.0   ;;  %p873_p3 = pnand %p872_p1, %p866_p13 }
  0x46   : > { %v221_v45 = vrot.slane %v220_v41, 2  ;;  %v252_v46 = vadd.f32 %v251_v42, %v250_v37  ;;  %v209_v47 = vadd.f32 %v208_v43, %v207_v38  ;;  %v822_v37 = vld [vmem:[%s1254_s1 + $0x18] sm:$0xff]   ;;  %v823_v38 = vld [vmem:[%s1254_s1 + $0x40] sm:$0xff]  }
  0x47   : > { %v240_v48 = vrot.slane %v239_v44, 4 }
  0x48   : > { %v222_v49 = vadd.f32 %v221_v45, %v220_v41  ;;  %v253_v50 = vrot.slane %v252_v46, 2  ;;  %v210_v51 = vrot.slane %v209_v47, 2 }
  0x49   : > { %v241_v52 = vadd.f32 %v240_v48, %v239_v44 }
  0x4a   : > { %v223_v53 = vrot.slane %v222_v49, 1  ;;  %v254_v54 = vadd.f32 %v253_v50, %v252_v46  ;;  %v211_v55 = vadd.f32 %v210_v51, %v209_v47 }
  0x4b   : > { %v242_v56 = vrot.slane %v241_v52, 2 }
  0x4c   : > { %v224_v57 = vadd.f32 %v223_v53, %v222_v49  ;;  %v255_v58 = vrot.slane %v254_v54, 1  ;;  %v212_v59 = vrot.slane %v211_v55, 1 }
  0x4d   : > { %v243_v60 = vadd.f32 %v242_v56, %v241_v52 }
  0x4e   : > { %v1122_v61 = vadd.f32 %v255_v58, %v254_v54  ;;  %v258_v62 = vmul.f32 %v224_v57, %v224_v57  ;;  %v213_v63 = vadd.f32 %v212_v59, %v211_v55 }
  0x4f   : > { %v244_v6 = vrot.slane %v243_v60, 1 }
  0x50   : > { %v260_v7 = vmul.f32 0.027777778, %v258_v62  ;;  %v257_v8 = vmul.f32 %v213_v63, %v213_v63 }
  0x51   : > { %v1124_v9 = vadd.f32 %v244_v6, %v243_v60 }
  0x52   : > { %v262_v11 = vsub.f32 %v1122_v61, %v260_v7  ;;  %v259_v12 = vmul.f32 0.027777778, %v257_v8 }
  0x54   : > { %v264_v15 = vmul.f32 0.028571429, %v262_v11  ;;  %v261_v16 = vsub.f32 %v1124_v9, %v259_v12 }
  0x56   : > { %v266_v17 = vadd.f32 1e-12, %v264_v15  ;;  %v263_v19 = vmul.f32 0.028571429, %v261_v16 }
  0x58   : > { %825 = vrsqrt.f32 %v266_v17  ;;  %v265_v20 = vadd.f32 1e-12, %v263_v19 }
  0x5a   : > { %827 = vrsqrt.f32 %v265_v20 }
  0x62   : > { %v1128_v21 = vpop.eup %825 }
  0x63   : > { %v270_v23 = vmul.f32 %v1128_v21, %v1068_v1  ;;  %v272_v24 = vmul.f32 %v1128_v21, %v1070_v2  ;;  %v274_v25 = vmul.f32 %v1128_v21, %v1072_v3  ;;  %v276_v26 = vmul.f32 %v1128_v21, %v1074_v4 }
  0x64   : > { %v1138_v27 = vpop.eup %827  ;;  %v278_v1 = vmul.f32 %v1128_v21, %v1076_v5 }
  0x65   : > { %v302_v28 = vpack.c.bf16 %v272_v24, %v270_v23  ;;  %v269_v29 = vmul.f32 %v1138_v27, %v1086_v10  ;;  %v271_v30 = vmul.f32 %v1138_v27, %v1092_v13  ;;  %v304_v31 = vpack.c.bf16 %v276_v26, %v274_v25 }
  0x66   : > { %v273_v2 = vmul.f32 %v1138_v27, %v1094_v14  ;;  %v275_v3 = vmul.f32 %v1138_v27, %v1107_v22  ;;  %v277_v4 = vmul.f32 %v1138_v27, %v1099_v18  ;;  %v306_v13 = vpack.c.bf16 %v278_v1, %v278_v1  ;;  %v816_v18 = vld [vmem:[%s1254_s1] sm:$0xff]   ;;  %v817_v22 = vld [vmem:[%s1254_s1 + $0x28] sm:$0xff]  }
  0x67   : > { %387 = vmatprep.subr.bf16.mxu0 %v302_v28  ;;  %v301_v32 = vpack.c.bf16 %v271_v30, %v269_v29  ;;  %757 = vmatprep.subr.bf16.mxu1 %v302_v28 }
  0x68   : > { %v303_v10 = vpack.c.bf16 %v275_v3, %v273_v2  ;;  %v305_v5 = vpack.c.bf16 %v277_v4, %v277_v4 }
  0x69   : > { %388 = vmatpush1.bf16.msra.mxu0 %v301_v32  ;;  %760 = vmatpush1.bf16.msra.mxu1 %v301_v32 }
  0x6a   : > { %389 = vmatprep.subr.bf16.mxu0 %v304_v31  ;;  %758 = vmatprep.subr.bf16.mxu1 %v304_v31  ;;  %v382_v14 = vsel %vm380_vm1, %v305_v5, 0 }
  0x6d   : > { %390 = vmatpush1.bf16.msra.mxu0 %v303_v10  ;;  %761 = vmatpush1.bf16.msra.mxu1 %v303_v10 }
  0x6e   : > { %721 = vmatprep.subr.msk.bf16.mxu0 %vm380_vm1, %v306_v13  ;;  %759 = vmatprep.subr.msk.bf16.mxu1 %vm380_vm1, %v306_v13 }
  0x71   : > { %392 = vmatpush1.bf16.msra.mxu0 %v382_v14  ;;  %762 = vmatpush1.bf16.msra.mxu1 %v382_v14 }
  0x74   : > { %722 = vmatmul.mubr.msk.bf16.vlgmr.msra.gmra.mrb[0].mxu0 %vm352_vm2, %v816_v18  ;;  %727 = vmatmul.mubr.msk.bf16.vlgmr.msra.gmra.mrb[0].mxu1 %vm352_vm2, %v817_v22 }
  0x75   : > { %429 = vmatprep.mubr.bf16.mxu0 %v935_v0  ;;  %479 = vmatprep.mubr.bf16.mxu1 %v935_v0 }
  0x7c   : > { %723 = vmatmul.mubr.msk.bf16.gmra.mrb[4].mxu0 %vm352_vm2, %v818_v33  ;;  %728 = vmatmul.mubr.msk.bf16.gmra.mrb[4].mxu1 %vm352_vm2, %v819_v34 }
  0x7d   : > { %439 = vmatprep.mubr.bf16.mxu0 %v935_v0  ;;  %489 = vmatprep.mubr.bf16.mxu1 %v935_v0 }
  0x84   : > { %724 = vmatmul.mubr.msk.bf16.gmra.mrb[8].mxu0 %vm352_vm2, %v820_v35  ;;  %729 = vmatmul.mubr.msk.bf16.gmra.mrb[8].mxu1 %vm352_vm2, %v821_v36 }
  0x85   : > { %449 = vmatprep.mubr.bf16.mxu0 %v935_v0  ;;  %499 = vmatprep.mubr.bf16.mxu1 %v935_v0 }
  0x8c   : > { %725 = vmatmul.mubr.msk.bf16.gmra.mrb[12].mxu0 %vm352_vm2, %v822_v37  ;;  %730 = vmatmul.mubr.msk.bf16.gmra.mrb[12].mxu1 %vm352_vm2, %v823_v38 }
  0x8d   : > { %459 = vmatprep.mubr.bf16.mxu0 %v935_v0  ;;  %597 = vmatprep.mubr.f32.mxu1 %v936_v40 }
  0x94   : > { %726 = vmatmul.mubr.msk.bf16.gmra.mrb[16].mxu0 %vm352_vm2, %v824_v39 }
 0x147   : > { %v421_v41 = vpop.f32.mrb[0].mxu0  ;;  %v471_v42 = vpop.f32.mrb[0].mxu1 }
 0x148   : > { %v423_v43 = vpop.f32.mrb[1].mxu0  ;;  %v473_v44 = vpop.f32.mrb[1].mxu1 }
 0x149   : > { %v425_v45 = vpop.f32.mrb[2].mxu0  ;;  %v475_v46 = vpop.f32.mrb[2].mxu1 }
 0x14a   : > { %v512_v47 = vmul.f32 %v471_v42, %v425_v45  ;;  %v427_v48 = vpop.f32.mrb[3].mxu0  ;;  %v477_v49 = vpop.f32.mrb[3].mxu1  ;;  %v528_v45 = vld [vmem:[%s1255_s2] sm:$0xff] }
 0x14b   : > { %v513_v50 = vmul.f32 %v473_v44, %v427_v48 }
 0x14f   : > { %v431_v51 = vpop.f32.mrb[4].mxu0  ;;  %v481_v0 = vpop.f32.mrb[4].mxu1 }
 0x150   : > { %v514_v52 = vmul.f32 %v475_v46, %v431_v51  ;;  %v433_v53 = vpop.f32.mrb[5].mxu0  ;;  %v483_v54 = vpop.f32.mrb[5].mxu1 }
 0x151   : > { %v515_v55 = vmul.f32 %v477_v49, %v433_v53  ;;  %v435_v56 = vpop.f32.mrb[6].mxu0  ;;  %v485_v57 = vpop.f32.mrb[6].mxu1 }
 0x152   : > { %v516_v58 = vmul.f32 %v481_v0, %v435_v56  ;;  %v437_v59 = vpop.f32.mrb[7].mxu0  ;;  %v487_v60 = vpop.f32.mrb[7].mxu1 }
 0x153   : > { %v517_v62 = vmul.f32 %v483_v54, %v437_v59 }
 0x154   : > { %v747_v63 = vpack.c.bf16 %v516_v58, %v514_v52 }
 0x155   : > { %v745_v6 = vpack.c.bf16 %v517_v62, %v515_v55 }
 0x157   : > { %v441_v7 = vpop.f32.mrb[8].mxu0  ;;  %v491_v8 = vpop.f32.mrb[8].mxu1 }
 0x158   : > { %v518_v11 = vmul.f32 %v485_v57, %v441_v7  ;;  %v443_v12 = vpop.f32.mrb[9].mxu0  ;;  %v493_v15 = vpop.f32.mrb[9].mxu1 }
 0x159   : > { %v519_v16 = vmul.f32 %v487_v60, %v443_v12  ;;  %v445_v17 = vpop.f32.mrb[10].mxu0  ;;  %v495_v19 = vpop.f32.mrb[10].mxu1 }
 0x15a   : > { %v520_v20 = vmul.f32 %v491_v8, %v445_v17  ;;  %v447_v23 = vpop.f32.mrb[11].mxu0  ;;  %v497_v24 = vpop.f32.mrb[11].mxu1 }
 0x15b   : > { %v521_v25 = vmul.f32 %v493_v15, %v447_v23 }
 0x15c   : > { %v751_v26 = vpack.c.bf16 %v520_v20, %v518_v11 }
 0x15d   : > { %v749_v28 = vpack.c.bf16 %v521_v25, %v519_v16 }
 0x15f   : > { %v451_v29 = vpop.f32.mrb[12].mxu0  ;;  %v501_v30 = vpop.f32.mrb[12].mxu1 }
 0x160   : > { %v522_v1 = vmul.f32 %v495_v19, %v451_v29  ;;  %v453_v31 = vpop.f32.mrb[13].mxu0  ;;  %v503_v2 = vpop.f32.mrb[13].mxu1 }
 0x161   : > { %v523_v3 = vmul.f32 %v497_v24, %v453_v31  ;;  %v455_v4 = vpop.f32.mrb[14].mxu0  ;;  %v505_v32 = vpop.f32.mrb[14].mxu1 }
 0x162   : > { %v524_v10 = vmul.f32 %v501_v30, %v455_v4  ;;  %v457_v13 = vpop.f32.mrb[15].mxu0  ;;  %v507_v5 = vpop.f32.mrb[15].mxu1 }
 0x163   : > { %v525_v14 = vmul.f32 %v503_v2, %v457_v13 }
 0x164   : > { %v755_v18 = vpack.c.bf16 %v524_v10, %v522_v1 }
 0x165   : > { %v753_v22 = vpack.c.bf16 %v525_v14, %v523_v3 }
 0x167   : > { %v461_v33 = vpop.f32.mrb[16].mxu0 }
 0x168   : > { %v526_v34 = vmul.f32 %v505_v32, %v461_v33  ;;  %v463_v35 = vpop.f32.mrb[17].mxu0 }
 0x169   : > { %v527_v36 = vmul.f32 %v507_v5, %v463_v35  ;;  %v465_v37 = vpop.f32.mrb[18].mxu0 }
 0x16a   : > { %v510_v38 = vmul.f32 %v465_v37, %v421_v41  ;;  %v467_v39 = vpop.f32.mrb[19].mxu0  ;;  %v279_v41 = vmul.f32 %v1138_v27, %v1138_v27 }
 0x16b   : > { %v511_v40 = vmul.f32 %v467_v39, %v423_v43  ;;  %v280_v43 = vmul.f32 %v1128_v21, %v1128_v21 }
 0x16c   : > { %v743_v42 = vpack.c.bf16 %v512_v47, %v510_v38  ;;  %v281_v46 = vmul.f32 %v279_v41, %v1124_v9 }
 0x16d   : > { %v741_v44 = vpack.c.bf16 %v513_v50, %v511_v40  ;;  %v282_v47 = vmul.f32 %v280_v43, %v1122_v61 }
 0x16f   : > { %742 = vmatprep.subr.bf16.mxu1 %v741_v44 }
 0x170   : > { %744 = vmatpush1.bf16.msra.mxu1 %v743_v42 }
 0x171   : > { %746 = vmatprep.subr.bf16.mxu1 %v745_v6 }
 0x174   : > { %748 = vmatpush1.bf16.msra.mxu1 %v747_v63 }
 0x175   : > { %750 = vmatprep.subr.bf16.mxu1 %v749_v28 }
 0x178   : > { %752 = vmatpush1.bf16.msra.mxu1 %v751_v26 }
 0x179   : > { %754 = vmatprep.subr.bf16.mxu1 %v753_v22 }
 0x17c   : > { %756 = vmatpush1.bf16.msra.mxu1 %v755_v18 }
 0x17d   : > { %549 = vmatprep.subr.mxu1 %v527_v36 }
 0x180   : > { %550 = vmatpush1.msra.mxu1 %v526_v34 }
 0x181   : > { %731 = vmatmul.mubr.msk.f32.vlgmr.msra.gmra.mrb[16].mxu1 %vm529_vm3, %v528_v45 }
 0x254   : > { %v599_v48 = vpop.f32.mrb[16].mxu1 }
 0x255   : > { %v604_v49 = vadd.f32 %v599_v48, %v281_v46  ;;  %v601_v50 = vpop.f32.mrb[17].mxu1 }
 0x256   : > { %v605_v51 = vadd.f32 %v601_v50, %v282_v47 }
 0x257   : > { %v606_v0 = vmul.f32 0.027777778, %v604_v49 }
 0x258   : > { %v607_v52 = vmul.f32 0.027777778, %v605_v51 }
 0x259   : > { %v608_v53 = vsub.f32 0.0, %v606_v0 }
 0x25a   : > { %v609_v54 = vsub.f32 0.0, %v607_v52 }
 0x25b   : > { %v610_v55 = vmul.f32 1.442695, %v608_v53 }
 0x25c   : > { %v612_v56 = vmul.f32 1.442695, %v609_v54 }
 0x25d   : > { %829 = vpow2.f32 %v610_v55 }
 0x25e   : > { %831 = vpow2.f32 %v612_v56 }
 0x267   : > { %v830_v21 = vpop.eup %829 }
 0x268   : > { %v832_v9 = vpop.eup %831  ;;  %v614_v27 = vmul.f32 1.5819767, %v830_v21 }
 0x269   : > { %v615_v61 = vmul.f32 1.5819767, %v832_v9 }
 0x26a   : > { %v732_v57 = vadd.f32 -1.0819767, %v614_v27 }
 0x26b   : > { %v733_v58 = vadd.f32 -1.0819767, %v615_v61 }
 0x26c   : > { %618 = vst [vmem:[%s188_s17] sm:$0xff] %v732_v57 }
 0x26d   : > { %619 = vst [vmem:[%s188_s17 + $0x8] sm:$0xff] %v733_v58 }
 0x26e   : > { %876 = shalt.err (!%p873_p3)
}
 0x26f   : > { %s877_s8 = scalar_lea.hbm %s1209_s26, 256  ;;  %s881_s11 = scalar_lea.hbm %s1256_s3, 512 }
 0x270   : > { %p878_p5 = scmp.ne.s32.totalorder %s1209_s26, %s877_s8  ;;  %p882_p9 = scmp.lt.u32.totalorder %s1209_s26, %s1256_s3 }
 0x271   : > { %p883_p0 = scmp.lt.u32.totalorder %s881_s11, %s877_s8  ;;  %p885_p6 = scmp.lt.u32.totalorder %s877_s8, %s1209_s26 }
 0x272   : > { %p879_p7 = pnand %p878_p5, %p1263_p11 }
 0x273   : > { %p884_p2 = por %p883_p0, %p882_p9 }
 0x274   : > { %p880_p8 = pneg %p879_p7 }
 0x275   : > { %p886_p12 = por %p885_p6, %p884_p2 }
 0x277   : > { %p887_p13 = pnand %p886_p12, %p880_p8 }
 0x279   : > { %890 = shalt.err (!%p887_p13)
}
 0x27a   : > { %767 = dma.vmem_to_hbm [thread:$0]  (%p1263_p11), %s1211_s19, 256, %s1209_s26, %s621_s27  }
 0x27b PF: > { %s647_s4 = sand.u32 1, %s917_s12   ;;  %p1264_p4 = scmp.ne.s32.totalorder %s1260_s24, 0 }
 0x27c   : > { %p1265_p10 = scmp.ge.s32.totalorder %s929_s15, 2  ;;  %s648_s6 = scalar_lea.sflag [#allocation4], %s647_s4 }
 0x27e   : > { %p774_p1 = pnand %p1265_p10, %p1264_p4 }
 0x280   : > { %912 = dma.done.wait (!%p774_p1), %s648_s6, 256  }
 0x281   : > { %914 = vsyncadd (!%p774_p1), %s648_s6, 4294967040  ;;  %p16_p3 = scmp.ge.s32.totalorder %s983_s18, 4   ;;  %s1266_s12 = smov %s921_s13 }
 0x282   : > { %s1267_s13 = smov %s925_s14  ;;  %s1268_s14 = smov %s995_s21 }
 0x283   : > { %s1269_s15 = smov %s983_s18  ;;  %18 = sbr.rel (!%p16_p3) target bundleno = 5 (0x5), region = 77 }
 0x28a   :  { %653 = vsyncpa [#allocation3], 1 }
 0x28b   :  { %655 = vsyncpa [#allocation3 + $0x1], 1 }
 0x28c   :  { %656 = vsyncpa [#allocation4], 1 }
 0x28d   :  { %658 = vsyncpa [#allocation4 + $0x1], 1 }

</bundles_post_ra>
